<compile_context>
chip_gen: v7x
topology: tpu7x:2x2x1
jax: 0.10.0
libtpu: 0.0.40
codegen_flags: <defaults>
</compile_context>

<pallas_src>
import jax
import jax.numpy as jnp
from jax.experimental import pallas as pl
from jax.experimental.pallas import tpu as pltpu

HIDDEN = 10
HIDDEN_PAD = 128   # hidden dim padded to one full lane width
OUT_PAD = 128      # n_actions padded to one full lane width


def mlp_kernel(x_ref, w1_ref, b1_ref, w2_ref, b2_ref, o_ref):
    x = x_ref[...]                      # (bm, n_states)   n_states tiny (4)
    w1 = w1_ref[...]                    # (n_states, HIDDEN_PAD)
    n_states = x.shape[1]

    # ---- Layer 1 on the VPU: K=4 is far too small for the MXU. ----
    # acc starts as the (zero-padded) bias row and broadcasts to (bm, 128).
    acc = b1_ref[...]                   # (1, HIDDEN_PAD)
    for k in range(n_states):           # static, unrolled at trace time
        acc = acc + x[:, k:k + 1] * w1[k:k + 1, :]
    h = jnp.maximum(acc, 0.0)           # ReLU; padded hidden lanes stay 0

    # ---- Layer 2 on the MXU: dense (bm,128) x (128,128). ----
    y = jnp.dot(h, w2_ref[...], preferred_element_type=jnp.float32)
    y = y + b2_ref[...]                 # (bm, OUT_PAD) + (1, OUT_PAD)
    o_ref[...] = y.astype(o_ref.dtype)


def policy_net_forward(x, w1p, b1p, w2p, b2p, n_actions, *, bm=256):
    """x: (B, n_states). Padded params from pad_params(). Returns (B, n_actions)."""
    B, n_states = x.shape
    hp = w1p.shape[1]
    op = w2p.shape[1]

    B_pad = pl.cdiv(B, bm) * bm
    if B_pad != B:
        x = jnp.pad(x, ((0, B_pad - B), (0, 0)))

    out = pl.pallas_call(
        mlp_kernel,
        out_shape=jax.ShapeDtypeStruct((B_pad, op), jnp.float32),
        grid=(B_pad // bm,),
        in_specs=[
            pl.BlockSpec((bm, n_states), lambda i: (i, 0)),   # x: tiled over batch
            pl.BlockSpec((n_states, hp), lambda i: (0, 0)),   # w1: resident
            pl.BlockSpec((1, hp), lambda i: (0, 0)),          # b1: resident
            pl.BlockSpec((hp, op), lambda i: (0, 0)),         # w2: resident
            pl.BlockSpec((1, op), lambda i: (0, 0)),          # b2: resident
        ],
        out_specs=pl.BlockSpec((bm, op), lambda i: (i, 0)),   # lane-dense (bm,128)
        compiler_params=pltpu.CompilerParams(
            dimension_semantics=("parallel",)),
    )(x, w1p, b1p, w2p, b2p)

    return out[:B, :n_actions]


def init_params(key, n_states, n_actions, hidden=HIDDEN):
    """Unpadded params matching the PyTorch module (weights transposed for x @ W)."""
    k1, k2, k3, k4 = jax.random.split(key, 4)
    w1 = 0.1 * jax.random.normal(k1, (n_states, hidden), dtype=jnp.float32)
    w2 = 0.1 * jax.random.normal(k2, (hidden, n_actions), dtype=jnp.float32)
    bound1 = 1.0 / (n_states ** 0.5)    # nn.Linear default bias init
    bound2 = 1.0 / (hidden ** 0.5)
    b1 = jax.random.uniform(k3, (1, hidden), jnp.float32, -bound1, bound1)
    b2 = jax.random.uniform(k4, (1, n_actions), jnp.float32, -bound2, bound2)
    return w1, b1, w2, b2


def pad_params(w1, b1, w2, b2, hidden_pad=HIDDEN_PAD, out_pad=OUT_PAD):
    """Zero-pad hidden/output dims to 128 so the kernel is lane-dense.
    Padding is all-zero, so the true output slice is unchanged."""
    n_states, hidden = w1.shape
    n_actions = w2.shape[1]
    w1p = jnp.zeros((n_states, hidden_pad), jnp.float32).at[:, :hidden].set(w1)
    b1p = jnp.zeros((1, hidden_pad), jnp.float32).at[:, :hidden].set(b1)
    w2p = jnp.zeros((hidden_pad, out_pad), jnp.float32).at[:hidden, :n_actions].set(w2)
    b2p = jnp.zeros((1, out_pad), jnp.float32).at[:, :n_actions].set(b2)
    return w1p, b1p, w2p, b2p


if __name__ == "__main__":
    n_states = 4      # e.g. CartPole observation dim
    n_actions = 2     # e.g. CartPole action dim
    batch = 1024      # batched policy forward (many envs/timesteps per call)

    key = jax.random.PRNGKey(0)
    kx, kp = jax.random.split(key)
    x = jax.random.normal(kx, (batch, n_states), dtype=jnp.float32)

    w1, b1, w2, b2 = init_params(kp, n_states, n_actions)
    w1p, b1p, w2p, b2p = pad_params(w1, b1, w2, b2)

    forward = jax.jit(policy_net_forward, static_argnames=("n_actions", "bm"))
    out = forward(x, w1p, b1p, w2p, b2p, n_actions, bm=256)
    out = jax.block_until_ready(out)

    # Reference in plain JAX with the *unpadded* params (same math as PyTorch).
    ref = jnp.maximum(x @ w1 + b1, 0.0) @ w2 + b2
    assert out.shape == (batch, n_actions)
    assert jnp.allclose(out, ref, atol=1e-5, rtol=1e-5)

    print("KERNEL_OK")
</pallas_src>

<mosaic_0001>
module attributes {stable_mosaic.version = 11 : i64} {
  func.func @mlp_kernel(%arg0: i32, %arg1: memref<256x4xf32, #tpu.memory_space<vmem>>, %arg2: memref<4x128xf32, #tpu.memory_space<vmem>>, %arg3: memref<1x128xf32, #tpu.memory_space<vmem>>, %arg4: memref<128x128xf32, #tpu.memory_space<vmem>>, %arg5: memref<1x128xf32, #tpu.memory_space<vmem>>, %arg6: memref<256x128xf32, #tpu.memory_space<vmem>>) attributes {dimension_semantics = [#tpu.dimension_semantics<parallel>], iteration_bounds = array<i64: 4>, scalar_prefetch = 0 : i64, scratch_operands = 0 : i64, tpu.core_type = #tpu.core_type<tc>, window_params = [{transform_indices = @transform_0, window_bounds = array<i64: 256, 4>}, {pipeline_mode = #tpu.pipeline_mode<synchronous>, transform_indices = @transform_1, window_bounds = array<i64: 4, 128>}, {pipeline_mode = #tpu.pipeline_mode<synchronous>, transform_indices = @transform_2, window_bounds = array<i64: 1, 128>}, {pipeline_mode = #tpu.pipeline_mode<synchronous>, transform_indices = @transform_3, window_bounds = array<i64: 128, 128>}, {pipeline_mode = #tpu.pipeline_mode<synchronous>, transform_indices = @transform_4, window_bounds = array<i64: 1, 128>}, {transform_indices = @transform_5, window_bounds = array<i64: 256, 128>}]} {
    %c0 = arith.constant 0 : index
    %c0_0 = arith.constant 0 : index
    %0 = vector.load %arg1[%c0, %c0_0] : memref<256x4xf32, #tpu.memory_space<vmem>>, vector<256x4xf32>
    %c0_1 = arith.constant 0 : index
    %c0_2 = arith.constant 0 : index
    %1 = vector.load %arg2[%c0_1, %c0_2] : memref<4x128xf32, #tpu.memory_space<vmem>>, vector<4x128xf32>
    %c0_3 = arith.constant 0 : index
    %c0_4 = arith.constant 0 : index
    %2 = vector.load %arg3[%c0_3, %c0_4] : memref<1x128xf32, #tpu.memory_space<vmem>>, vector<1x128xf32>
    %3 = vector.extract_strided_slice %0 {offsets = [0, 0], sizes = [256, 1], strides = [1, 1]} : vector<256x4xf32> to vector<256x1xf32>
    %4 = vector.extract_strided_slice %1 {offsets = [0, 0], sizes = [1, 128], strides = [1, 1]} : vector<4x128xf32> to vector<1x128xf32>
    %5 = vector.broadcast %3 : vector<256x1xf32> to vector<256x128xf32>
    %6 = vector.broadcast %4 : vector<1x128xf32> to vector<256x128xf32>
    %7 = arith.mulf %5, %6 : vector<256x128xf32>
    %8 = vector.broadcast %2 : vector<1x128xf32> to vector<256x128xf32>
    %9 = arith.addf %8, %7 : vector<256x128xf32>
    %10 = vector.extract_strided_slice %0 {offsets = [0, 1], sizes = [256, 1], strides = [1, 1]} : vector<256x4xf32> to vector<256x1xf32>
    %11 = vector.extract_strided_slice %1 {offsets = [1, 0], sizes = [1, 128], strides = [1, 1]} : vector<4x128xf32> to vector<1x128xf32>
    %12 = vector.broadcast %10 : vector<256x1xf32> to vector<256x128xf32>
    %13 = vector.broadcast %11 : vector<1x128xf32> to vector<256x128xf32>
    %14 = arith.mulf %12, %13 : vector<256x128xf32>
    %15 = arith.addf %9, %14 : vector<256x128xf32>
    %16 = vector.extract_strided_slice %0 {offsets = [0, 2], sizes = [256, 1], strides = [1, 1]} : vector<256x4xf32> to vector<256x1xf32>
    %17 = vector.extract_strided_slice %1 {offsets = [2, 0], sizes = [1, 128], strides = [1, 1]} : vector<4x128xf32> to vector<1x128xf32>
    %18 = vector.broadcast %16 : vector<256x1xf32> to vector<256x128xf32>
    %19 = vector.broadcast %17 : vector<1x128xf32> to vector<256x128xf32>
    %20 = arith.mulf %18, %19 : vector<256x128xf32>
    %21 = arith.addf %15, %20 : vector<256x128xf32>
    %22 = vector.extract_strided_slice %0 {offsets = [0, 3], sizes = [256, 1], strides = [1, 1]} : vector<256x4xf32> to vector<256x1xf32>
    %23 = vector.extract_strided_slice %1 {offsets = [3, 0], sizes = [1, 128], strides = [1, 1]} : vector<4x128xf32> to vector<1x128xf32>
    %24 = vector.broadcast %22 : vector<256x1xf32> to vector<256x128xf32>
    %25 = vector.broadcast %23 : vector<1x128xf32> to vector<256x128xf32>
    %26 = arith.mulf %24, %25 : vector<256x128xf32>
    %27 = arith.addf %21, %26 : vector<256x128xf32>
    %cst = arith.constant 0.000000e+00 : f32
    %28 = vector.broadcast %cst : f32 to vector<256x128xf32>
    %29 = arith.maximumf %27, %28 : vector<256x128xf32>
    %c0_5 = arith.constant 0 : index
    %c0_6 = arith.constant 0 : index
    %30 = vector.load %arg4[%c0_5, %c0_6] : memref<128x128xf32, #tpu.memory_space<vmem>>, vector<128x128xf32>
    %cst_7 = arith.constant dense<0.000000e+00> : vector<256x128xf32>
    %31 = tpu.matmul %29, %30, %cst_7 {dimension_numbers = #tpu.dot_dimension_numbers<[1], [0], [0], [1], [0, 0, 1, 1], [], []>} : vector<256x128xf32>, vector<128x128xf32>, vector<256x128xf32> -> vector<256x128xf32>
    %c0_8 = arith.constant 0 : index
    %c0_9 = arith.constant 0 : index
    %32 = vector.load %arg5[%c0_8, %c0_9] : memref<1x128xf32, #tpu.memory_space<vmem>>, vector<1x128xf32>
    %33 = vector.broadcast %32 : vector<1x128xf32> to vector<256x128xf32>
    %34 = arith.addf %31, %33 : vector<256x128xf32>
    %c0_10 = arith.constant 0 : index
    %c0_11 = arith.constant 0 : index
    %35 = vector.load %arg6[%c0_10, %c0_11] : memref<256x128xf32, #tpu.memory_space<vmem>>, vector<256x128xf32>
    tpu.vector_store %arg6[%c0_10, %c0_11], %34 {strides = array<i32>} : memref<256x128xf32, #tpu.memory_space<vmem>>, vector<256x128xf32>,
    return
  }
  func.func @transform_0(%arg0: i32) -> (i32, i32) {
    %c0_i32 = arith.constant 0 : i32
    %c0_i32_0 = arith.constant 0 : i32
    return %arg0, %c0_i32 : i32, i32
  }
  func.func @transform_1(%arg0: i32) -> (i32, i32) {
    %c0_i32 = arith.constant 0 : i32
    %c0_i32_0 = arith.constant 0 : i32
    %c0_i32_1 = arith.constant 0 : i32
    return %c0_i32, %c0_i32_0 : i32, i32
  }
  func.func @transform_2(%arg0: i32) -> (i32, i32) {
    %c0_i32 = arith.constant 0 : i32
    %c0_i32_0 = arith.constant 0 : i32
    %c0_i32_1 = arith.constant 0 : i32
    return %c0_i32, %c0_i32_0 : i32, i32
  }
  func.func @transform_3(%arg0: i32) -> (i32, i32) {
    %c0_i32 = arith.constant 0 : i32
    %c0_i32_0 = arith.constant 0 : i32
    %c0_i32_1 = arith.constant 0 : i32
    return %c0_i32, %c0_i32_0 : i32, i32
  }
  func.func @transform_4(%arg0: i32) -> (i32, i32) {
    %c0_i32 = arith.constant 0 : i32
    %c0_i32_0 = arith.constant 0 : i32
    %c0_i32_1 = arith.constant 0 : i32
    return %c0_i32, %c0_i32_0 : i32, i32
  }
  func.func @transform_5(%arg0: i32) -> (i32, i32) {
    %c0_i32 = arith.constant 0 : i32
    %c0_i32_0 = arith.constant 0 : i32
    return %arg0, %c0_i32 : i32, i32
  }
}

</mosaic_0001>

<bundles_post_ra>
// kernel: policy_net_forward.1
= control target key start
LH: loop header
LB: loop body
LE: loop exit
PB: predicated region body
PF: predicated region fallthrough
CT: control target
= control target key end

     0   :  { %s1737_s18 = smov 0   ;;  %s2536_s0 = inlined_call_operand.vmem [shape: f32[1024,4], index: 0, kind: input, shape index: {}]   ;;  %s2537_s1 = inlined_call_operand.vmem [shape: f32[4,128], index: 1, kind: input, shape index: {}]   ;;  %s2538_s2 = inlined_call_operand.vmem [shape: f32[1,128], index: 2, kind: input, shape index: {}]   ;;  %s2539_s3 = inlined_call_operand.vmem [shape: f32[128,128], index: 3, kind: input, shape index: {}]   ;;  %s2540_s4 = inlined_call_operand.vmem [shape: f32[1,128], index: 4, kind: input, shape index: {}]   ;;  %s2541_s5 = inlined_call_operand.vmem [shape: f32[1024,128], index: 5, kind: output, shape index: {}]  }
   0x1 LB: > { %s1452_s19 = sadd.s32 4294967295, %s1701_s18   ;;  %p1456_p0 = scmp.ge.s32.totalorder %s1701_s18, 1  ;;  %s1701_s18 = sphi %s1737_s18, %s15_s18  }
   0x2   : > { %p188_p1 = scmp.lt.s32.totalorder %s1701_s18, 5 }
   0x4   : > { %p189_p2 = pnand %p1456_p0, %p188_p1 }
   0x6   : > { %192 = sbr.rel (%p189_p2) target bundleno = 693 (0x2b5), region = 40 }
   0xd   : > { %s1457_s20 = sshll.u32 %s1452_s19, 5  ;;  %v1703_v0 = vmov 0   ;;  %v2544_v33 = vmov 1   ;;  %v1116_v34 = vld [vmem:[%s2539_s3] sm:$0xff]  ;;  %v1117_v35 = vld [vmem:[%s2539_s3 + $0x8] sm:$0xff]  ;;  %v1118_v37 = vld [vmem:[%s2539_s3 + $0x10] sm:$0xff]  ;;  %v422_v57 = vlaneseq }
   0xe   : > { %1654 = vset.pattern.permute.xlu1 %v1703_v0  ;;  %1653 = vset.pattern.permute.xlu0 %v1703_v0  ;;  %p217_p3 = scmp.lt.s32.totalorder %s1457_s20, 127  ;;  %v1593_v36 = vpack.c.bf16 %v1117_v35, %v1116_v34  ;;  %v1119_v38 = vld [vmem:[%s2539_s3 + $0x18] sm:$0xff]  ;;  %v2542_v40 = vmov 2   ;;  %v1120_v41 = vld [vmem:[%s2539_s3 + $0x20] sm:$0xff]  ;;  %v1121_v42 = vld [vmem:[%s2539_s3 + $0x28] sm:$0xff]  ;;  %v2546_v50 = vmov 3  }
   0xf   : > { %v1597_v39 = vpack.c.bf16 %v1119_v38, %v1118_v37  ;;  %v1601_v43 = vpack.c.bf16 %v1121_v42, %v1120_v41  ;;  %v1122_v44 = vld [vmem:[%s2539_s3 + $0x30] sm:$0xff]  ;;  %v1123_v45 = vld [vmem:[%s2539_s3 + $0x38] sm:$0xff]  ;;  %v1124_v47 = vld [vmem:[%s2539_s3 + $0x40] sm:$0xff]  ;;  %v1967_v61 = vshrl.u32 %v422_v57, 7 }
  0x10   : > { %s2584_s20 = smov (!%p217_p3, %s1457_s20), 127  ;;  %1594 = vmatprep.subr.bf16.mxu0 %v1593_v36  ;;  %1625 = vmatprep.subr.bf16.mxu1 %v1593_v36  ;;  %v1605_v46 = vpack.c.bf16 %v1123_v45, %v1122_v44  ;;  %v1125_v48 = vld [vmem:[%s2539_s3 + $0x48] sm:$0xff]  ;;  %v1126_v51 = vld [vmem:[%s2539_s3 + $0x50] sm:$0xff]  ;;  %v1127_v52 = vld [vmem:[%s2539_s3 + $0x58] sm:$0xff] }
  0x11   : > { %s1458_s21 = sshll.u32 %s2584_s20, 3  ;;  %1596 = vmatpush3.bf16.msra.mxu0 %v1593_v36  ;;  %1633 = vmatpush3.bf16.msra.mxu1 %v1593_v36  ;;  %v1609_v49 = vpack.c.bf16 %v1125_v48, %v1124_v47  ;;  %v1613_v53 = vpack.c.bf16 %v1127_v52, %v1126_v51  ;;  %v1128_v54 = vld [vmem:[%s2539_s3 + $0x60] sm:$0xff]  ;;  %v1129_v55 = vld [vmem:[%s2539_s3 + $0x68] sm:$0xff]  ;;  %v1130_v58 = vld [vmem:[%s2539_s3 + $0x70] sm:$0xff]  ;;  %v424_v0 = vsub.s32 0, %v1967_v61 }
  0x12   : > { %s1753_s24 = scalar_lea.vmem %s2536_s0, %s1458_s21  ;;  %1598 = vmatprep.subr.bf16.mxu0 %v1597_v39  ;;  %1626 = vmatprep.subr.bf16.mxu1 %v1597_v39  ;;  %v1617_v56 = vpack.c.bf16 %v1129_v55, %v1128_v54  ;;  %v1131_v59 = vld [vmem:[%s2539_s3 + $0x78] sm:$0xff]  ;;  %s2467_s19 = scalar_lea.vmem %s2541_s5, %s1458_s21 }
  0x13   : > { %v1756_v1 = vld [vmem:[%s1753_s24 + $0x10] sm:$0xff]  ;;  %v1759_v2 = vld [vmem:[%s1753_s24] sm:$0xff]  ;;  %v1764_v3 = vld [vmem:[%s1753_s24 + $0x18] sm:$0xff]  ;;  %v1621_v60 = vpack.c.bf16 %v1131_v59, %v1130_v58 }
  0x14   : > { %274 = vperm.xlu1 %1654, %v1756_v1   ;;  %264 = vperm.xlu0 %1653, %v1759_v2   ;;  %v1767_v4 = vld [vmem:[%s1753_s24 + $0x8] sm:$0xff]  ;;  %v1775_v6 = vld [vmem:[%s1753_s24 + $0x20] sm:$0xff]  ;;  %v1780_v7 = vld [vmem:[%s1753_s24 + $0x38] sm:$0xff] }
  0x15   : > { %v1772_v5 = vld [vmem:[%s1753_s24 + $0x28] sm:$0xff]  ;;  %v1783_v8 = vld [vmem:[%s1753_s24 + $0x30] sm:$0xff]  ;;  %v1791_v10 = vld [vmem:[%s1753_s24 + $0x40] sm:$0xff]  ;;  %1600 = vmatpush3.bf16.msra.mxu0 %v1597_v39  ;;  %1634 = vmatpush3.bf16.msra.mxu1 %v1597_v39 }
  0x16   : > { %v1788_v9 = vld [vmem:[%s1753_s24 + $0x48] sm:$0xff]  ;;  %v1796_v11 = vld [vmem:[%s1753_s24 + $0x58] sm:$0xff]  ;;  %v1799_v12 = vld [vmem:[%s1753_s24 + $0x50] sm:$0xff]  ;;  %1602 = vmatprep.subr.bf16.mxu0 %v1601_v43  ;;  %1627 = vmatprep.subr.bf16.mxu1 %v1601_v43 }
  0x17   : > { %v1804_v13 = vld [vmem:[%s1753_s24 + $0x68] sm:$0xff]  ;;  %v1807_v14 = vld [vmem:[%s1753_s24 + $0x60] sm:$0xff]  ;;  %v1812_v15 = vld [vmem:[%s1753_s24 + $0x78] sm:$0xff] }
  0x18   : > { %279 = vperm.xlu1 %1654, %v1764_v3   ;;  %269 = vperm.xlu0 %1653, %v1767_v4   ;;  %v1815_v16 = vld [vmem:[%s1753_s24 + $0x70] sm:$0xff]  ;;  %v1820_v17 = vld [vmem:[%s1753_s24 + $0x88] sm:$0xff]  ;;  %v1823_v18 = vld [vmem:[%s1753_s24 + $0x80] sm:$0xff] }
  0x19   : > { %v1828_v19 = vld [vmem:[%s1753_s24 + $0x98] sm:$0xff]  ;;  %v1831_v20 = vld [vmem:[%s1753_s24 + $0x90] sm:$0xff]  ;;  %v1836_v21 = vld [vmem:[%s1753_s24 + $0xa8] sm:$0xff]  ;;  %1604 = vmatpush3.bf16.msra.mxu0 %v1601_v43  ;;  %1635 = vmatpush3.bf16.msra.mxu1 %v1601_v43 }
  0x1a   : > { %v1839_v22 = vld [vmem:[%s1753_s24 + $0xa0] sm:$0xff]  ;;  %v1844_v23 = vld [vmem:[%s1753_s24 + $0xb8] sm:$0xff]  ;;  %v1847_v24 = vld [vmem:[%s1753_s24 + $0xb0] sm:$0xff]  ;;  %1606 = vmatprep.subr.bf16.mxu0 %v1605_v46  ;;  %1628 = vmatprep.subr.bf16.mxu1 %v1605_v46 }
  0x1b   : > { %v1852_v25 = vld [vmem:[%s1753_s24 + $0xc8] sm:$0xff]  ;;  %v1855_v26 = vld [vmem:[%s1753_s24 + $0xc0] sm:$0xff]  ;;  %v1860_v27 = vld [vmem:[%s1753_s24 + $0xd8] sm:$0xff] }
  0x1c   : > { %289 = vperm.xlu1 %1654, %v1772_v5   ;;  %284 = vperm.xlu0 %1653, %v1775_v6   ;;  %v1863_v28 = vld [vmem:[%s1753_s24 + $0xd0] sm:$0xff]  ;;  %v1868_v29 = vld [vmem:[%s1753_s24 + $0xe8] sm:$0xff]  ;;  %v1871_v30 = vld [vmem:[%s1753_s24 + $0xe0] sm:$0xff] }
  0x1d   : > { %v1876_v31 = vld [vmem:[%s1753_s24 + $0xf8] sm:$0xff]  ;;  %v1879_v32 = vld [vmem:[%s1753_s24 + $0xf0] sm:$0xff]  ;;  %1608 = vmatpush3.bf16.msra.mxu0 %v1605_v46  ;;  %1636 = vmatpush3.bf16.msra.mxu1 %v1605_v46  ;;  %v1997_v39 = vld [vmem:[%s2538_s2] ss:$0 sm:$0xff] }
  0x1e   : > { %1610 = vmatprep.subr.bf16.mxu0 %v1609_v49  ;;  %1629 = vmatprep.subr.bf16.mxu1 %v1609_v49 }
  0x20   : > { %299 = vperm.xlu1 %1654, %v1780_v7   ;;  %294 = vperm.xlu0 %1653, %v1783_v8  }
  0x21   : > { %1612 = vmatpush3.bf16.msra.mxu0 %v1609_v49  ;;  %1637 = vmatpush3.bf16.msra.mxu1 %v1609_v49 }
  0x22   : > { %1614 = vmatprep.subr.bf16.mxu0 %v1613_v53  ;;  %1630 = vmatprep.subr.bf16.mxu1 %v1613_v53 }
  0x24   : > { %309 = vperm.xlu1 %1654, %v1788_v9   ;;  %304 = vperm.xlu0 %1653, %v1791_v10  }
  0x25   : > { %1616 = vmatpush3.bf16.msra.mxu0 %v1613_v53  ;;  %1638 = vmatpush3.bf16.msra.mxu1 %v1613_v53 }
  0x26   : > { %1618 = vmatprep.subr.bf16.mxu0 %v1617_v56  ;;  %1631 = vmatprep.subr.bf16.mxu1 %v1617_v56 }
  0x28   : > { %319 = vperm.xlu1 %1654, %v1796_v11   ;;  %314 = vperm.xlu0 %1653, %v1799_v12  }
  0x29   : > { %1620 = vmatpush3.bf16.msra.mxu0 %v1617_v56  ;;  %1639 = vmatpush3.bf16.msra.mxu1 %v1617_v56 }
  0x2a   : > { %1622 = vmatprep.subr.bf16.mxu0 %v1621_v60  ;;  %1632 = vmatprep.subr.bf16.mxu1 %v1621_v60 }
  0x2c   : > { %329 = vperm.xlu1 %1654, %v1804_v13   ;;  %324 = vperm.xlu0 %1653, %v1807_v14  }
  0x2d   : > { %1624 = vmatpush3.bf16.msra.mxu0 %v1621_v60  ;;  %1640 = vmatpush3.bf16.msra.mxu1 %v1621_v60 }
  0x30   : > { %339 = vperm.xlu1 %1654, %v1812_v15   ;;  %334 = vperm.xlu0 %1653, %v1815_v16  }
  0x34   : > { %349 = vperm.xlu1 %1654, %v1820_v17   ;;  %344 = vperm.xlu0 %1653, %v1823_v18  }
  0x38   : > { %359 = vperm.xlu1 %1654, %v1828_v19   ;;  %354 = vperm.xlu0 %1653, %v1831_v20  }
  0x3c   : > { %369 = vperm.xlu1 %1654, %v1836_v21   ;;  %364 = vperm.xlu0 %1653, %v1839_v22  }
  0x40   : > { %379 = vperm.xlu1 %1654, %v1844_v23   ;;  %374 = vperm.xlu0 %1653, %v1847_v24  }
  0x44   : > { %389 = vperm.xlu1 %1654, %v1852_v25   ;;  %384 = vperm.xlu0 %1653, %v1855_v26  }
  0x48   : > { %399 = vperm.xlu1 %1654, %v1860_v27   ;;  %394 = vperm.xlu0 %1653, %v1863_v28  }
  0x4c   : > { %409 = vperm.xlu1 %1654, %v1868_v29   ;;  %404 = vperm.xlu0 %1653, %v1871_v30  }
  0x50   : > { %419 = vperm.xlu1 %1654, %v1876_v31   ;;  %414 = vperm.xlu0 %1653, %v1879_v32  }
  0x54   : > { %1656 = vset.pattern.permute.xlu1 %v2544_v33  ;;  %1655 = vset.pattern.permute.xlu0 %v2544_v33 }
  0x55   : > { %501 = vperm.xlu1 %1656, %v1767_v4   ;;  %497 = vperm.xlu0 %1655, %v1759_v2  }
  0x59   : > { %505 = vperm.xlu1 %1656, %v1756_v1   ;;  %509 = vperm.xlu0 %1655, %v1764_v3  }
  0x5d   : > { %513 = vperm.xlu1 %1656, %v1775_v6   ;;  %517 = vperm.xlu0 %1655, %v1772_v5  }
  0x61   : > { %521 = vperm.xlu1 %1656, %v1783_v8   ;;  %525 = vperm.xlu0 %1655, %v1780_v7  }
  0x65   : > { %529 = vperm.xlu1 %1656, %v1791_v10   ;;  %533 = vperm.xlu0 %1655, %v1788_v9  }
  0x69   : > { %537 = vperm.xlu1 %1656, %v1799_v12   ;;  %541 = vperm.xlu0 %1655, %v1796_v11  }
  0x6d   : > { %545 = vperm.xlu1 %1656, %v1807_v14   ;;  %549 = vperm.xlu0 %1655, %v1804_v13  }
  0x71   : > { %553 = vperm.xlu1 %1656, %v1815_v16   ;;  %557 = vperm.xlu0 %1655, %v1812_v15  }
  0x75   : > { %561 = vperm.xlu1 %1656, %v1823_v18   ;;  %565 = vperm.xlu0 %1655, %v1820_v17  }
  0x79   : > { %1657 = vset.pattern.permute.xlu1 %v2542_v40  ;;  %569 = vperm.xlu0 %1655, %v1831_v20  }
  0x7a   : > { %693 = vperm.xlu1 %1657, %v1759_v2  }
  0x7d   : > { %573 = vperm.xlu0 %1655, %v1828_v19  }
  0x7e   : > { %697 = vperm.xlu1 %1657, %v1767_v4  }
  0x81   : > { %1659 = vset.pattern.permute.xlu0 %v2542_v40 }
  0x82   : > { %761 = vperm.xlu1 %1657, %v1820_v17   ;;  %757 = vperm.xlu0 %1659, %v1823_v18  }
  0x86   : > { %1658 = vset.pattern.permute.xlu1 %v2546_v50  ;;  %705 = vperm.xlu0 %1659, %v1764_v3  }
  0x87   : > { %889 = vperm.xlu1 %1658, %v1759_v2   ;;  %v1980_v2 = vld [vmem:[%s2537_s1] sm:$0xf] }
  0x88   : > { %v1988_v34 = vrot.slane %v1980_v2, %v424_v0 }
  0x8a   : > { %709 = vperm.xlu0 %1659, %v1775_v6  }
  0x8b   : > { %953 = vperm.xlu1 %1658, %v1823_v18  }
  0x8e   : > { %777 = vperm.xlu0 %1659, %v1836_v21  }
  0x8f   : > { %893 = vperm.xlu1 %1658, %v1767_v4  }
  0x92   : > { %717 = vperm.xlu0 %1659, %v1783_v8  }
  0x93   : > { %v1969_v62 = vpop.permute.xlu1 %274  ;;  %1660 = vset.pattern.permute.xlu1 %v2542_v40  ;;  %v1972_v63 = vpop.permute.xlu0 %264 }
  0x94   : > { %701 = vperm.xlu1 %1660, %v1756_v1  }
  0x96   : > { %785 = vperm.xlu0 %1659, %v1844_v23  }
  0x97   : > { %v1982_v4 = vpop.permute.xlu1 %279  ;;  %v1984_v18 = vpop.permute.xlu0 %269 }
  0x98   : > { %765 = vperm.xlu1 %1660, %v1831_v20  }
  0x9a   : > { %725 = vperm.xlu0 %1659, %v1791_v10  }
  0x9b   : > { %v290_v35 = vpop.permute.xlu1 %289  ;;  %v285_v36 = vpop.permute.xlu0 %284 }
  0x9c   : > { %v431_v37 = vmul.f32 %v1988_v34, %v290_v35  ;;  %769 = vperm.xlu1 %1660, %v1828_v19   ;;  %v430_v38 = vmul.f32 %v1988_v34, %v285_v36 }
  0x9e   : > { %v2000_v41 = vadd.f32 %v1997_v39, %v431_v37  ;;  %v2003_v42 = vadd.f32 %v1997_v39, %v430_v38  ;;  %793 = vperm.xlu0 %1659, %v1852_v25  }
  0x9f   : > { %v300_v43 = vpop.permute.xlu1 %299  ;;  %v295_v44 = vpop.permute.xlu0 %294 }
  0xa0   : > { %v433_v45 = vmul.f32 %v1988_v34, %v300_v43  ;;  %1661 = vset.pattern.permute.xlu1 %v2544_v33  ;;  %v432_v46 = vmul.f32 %v1988_v34, %v295_v44 }
  0xa1   : > { %577 = vperm.xlu1 %1661, %v1839_v22  }
  0xa2   : > { %v2011_v47 = vadd.f32 %v1997_v39, %v433_v45  ;;  %v2014_v48 = vadd.f32 %v1997_v39, %v432_v46  ;;  %733 = vperm.xlu0 %1659, %v1799_v12  }
  0xa3   : > { %v310_v49 = vpop.permute.xlu1 %309  ;;  %v305_v51 = vpop.permute.xlu0 %304 }
  0xa4   : > { %v435_v52 = vmul.f32 %v1988_v34, %v310_v49  ;;  %v434_v53 = vmul.f32 %v1988_v34, %v305_v51 }
  0xa5   : > { %1662 = vset.pattern.permute.xlu1 %v2546_v50 }
  0xa6   : > { %v2021_v54 = vadd.f32 %v1997_v39, %v435_v52  ;;  %v2024_v55 = vadd.f32 %v1997_v39, %v434_v53  ;;  %961 = vperm.xlu1 %1662, %v1831_v20   ;;  %801 = vperm.xlu0 %1659, %v1860_v27  }
  0xa7   : > { %v320_v56 = vpop.permute.xlu1 %319  ;;  %v315_v57 = vpop.permute.xlu0 %314 }
  0xa8   : > { %2548 = vst [vmem:[#allocation2_spill] sm:$0xff] %v2024_v55  ;;  %v437_v58 = vmul.f32 %v1988_v34, %v320_v56  ;;  %v436_v59 = vmul.f32 %v1988_v34, %v315_v57 }
  0xaa   : > { %v2031_v60 = vadd.f32 %v1997_v39, %v437_v58  ;;  %v2034_v0 = vadd.f32 %v1997_v39, %v436_v59  ;;  %1663 = vset.pattern.permute.xlu1 %v2544_v33  ;;  %741 = vperm.xlu0 %1659, %v1807_v14  }
  0xab   : > { %v330_v35 = vpop.permute.xlu1 %329  ;;  %581 = vperm.xlu1 %1663, %v1836_v21   ;;  %v325_v20 = vpop.permute.xlu0 %324 }
  0xac   : > { %v439_v36 = vmul.f32 %v1988_v34, %v330_v35  ;;  %v438_v37 = vmul.f32 %v1988_v34, %v325_v20 }
  0xae   : > { %v2042_v38 = vadd.f32 %v1997_v39, %v439_v36  ;;  %v2045_v43 = vadd.f32 %v1997_v39, %v438_v37  ;;  %809 = vperm.xlu0 %1659, %v1868_v29  }
  0xaf   : > { %v340_v44 = vpop.permute.xlu1 %339  ;;  %1664 = vset.pattern.permute.xlu1 %v2546_v50  ;;  %v335_v45 = vpop.permute.xlu0 %334 }
  0xb0   : > { %v441_v46 = vmul.f32 %v1988_v34, %v340_v44  ;;  %965 = vperm.xlu1 %1664, %v1828_v19   ;;  %v440_v49 = vmul.f32 %v1988_v34, %v335_v45 }
  0xb2   : > { %v2053_v51 = vadd.f32 %v1997_v39, %v441_v46  ;;  %v2056_v52 = vadd.f32 %v1997_v39, %v440_v49  ;;  %749 = vperm.xlu0 %1659, %v1815_v16  }
  0xb3   : > { %v2059_v53 = vpop.permute.xlu1 %349  ;;  %v2061_v56 = vpop.permute.xlu0 %344 }
  0xb4   : > { %1665 = vset.pattern.permute.xlu1 %v2542_v40 }
  0xb5   : > { %773 = vperm.xlu1 %1665, %v1839_v22  }
  0xb6   : > { %817 = vperm.xlu0 %1659, %v1876_v31  }
  0xb7   : > { %v2066_v19 = vpop.permute.xlu1 %359  ;;  %v2068_v57 = vpop.permute.xlu0 %354 }
  0xb9   : > { %713 = vperm.xlu1 %1665, %v1772_v5  }
  0xba   : > { %1691 = vset.pattern.permute.xlu0 %v2546_v50 }
  0xbb   : > { %v370_v58 = vpop.permute.xlu1 %369  ;;  %957 = vperm.xlu0 %1691, %v1820_v17   ;;  %v2073_v16 = vpop.permute.xlu0 %364 }
  0xbc   : > { %v447_v59 = vmul.f32 %v1988_v34, %v370_v58 }
  0xbd   : > { %1666 = vset.pattern.permute.xlu1 %v2544_v33 }
  0xbe   : > { %v2078_v35 = vadd.f32 %v1997_v39, %v447_v59  ;;  %585 = vperm.xlu1 %1666, %v1847_v24  }
  0xbf   : > { %v380_v20 = vpop.permute.xlu1 %379  ;;  %897 = vperm.xlu0 %1691, %v1756_v1   ;;  %v375_v36 = vpop.permute.xlu0 %374 }
  0xc0   : > { %v449_v37 = vmul.f32 %v1988_v34, %v380_v20  ;;  %v448_v44 = vmul.f32 %v1988_v34, %v375_v36 }
  0xc2   : > { %v2085_v17 = vadd.f32 %v1997_v39, %v449_v37  ;;  %v2088_v45 = vadd.f32 %v1997_v39, %v448_v44  ;;  %1667 = vset.pattern.permute.xlu1 %v2546_v50 }
  0xc3   : > { %v390_v46 = vpop.permute.xlu1 %389  ;;  %969 = vperm.xlu1 %1667, %v1839_v22   ;;  %901 = vperm.xlu0 %1691, %v1764_v3   ;;  %v385_v49 = vpop.permute.xlu0 %384 }
  0xc4   : > { %2549 = vst [vmem:[#allocation3_spill] sm:$0xff] %v2088_v45  ;;  %v451_v1 = vmul.f32 %v1988_v34, %v390_v46  ;;  %v450_v58 = vmul.f32 %v1988_v34, %v385_v49 }
  0xc6   : > { %v2096_v59 = vadd.f32 %v1997_v39, %v451_v1  ;;  %v2099_v20 = vadd.f32 %v1997_v39, %v450_v58 }
  0xc7   : > { %v400_v36 = vpop.permute.xlu1 %399  ;;  %1668 = vset.pattern.permute.xlu1 %v2544_v33  ;;  %905 = vperm.xlu0 %1691, %v1775_v6   ;;  %v395_v37 = vpop.permute.xlu0 %394 }
  0xc8   : > { %2550 = vst [vmem:[#allocation4_spill] sm:$0xff] %v2096_v59  ;;  %2551 = vst [vmem:[#allocation5_spill] sm:$0xff] %v2099_v20  ;;  %v453_v22 = vmul.f32 %v1988_v34, %v400_v36  ;;  %589 = vperm.xlu1 %1668, %v1844_v23   ;;  %v452_v3 = vmul.f32 %v1988_v34, %v395_v37 }
  0xca   : > { %v2107_v44 = vadd.f32 %v1997_v39, %v453_v22  ;;  %v2110_v46 = vadd.f32 %v1997_v39, %v452_v3 }
  0xcb   : > { %v410_v49 = vpop.permute.xlu1 %409  ;;  %909 = vperm.xlu0 %1691, %v1772_v5   ;;  %v405_v1 = vpop.permute.xlu0 %404 }
  0xcc   : > { %2552 = vst [vmem:[#allocation6_spill] sm:$0xff] %v2107_v44  ;;  %2553 = vst [vmem:[#allocation7_spill] sm:$0xff] %v2110_v46  ;;  %v455_v58 = vmul.f32 %v1988_v34, %v410_v49  ;;  %1669 = vset.pattern.permute.xlu1 %v2546_v50  ;;  %v454_v6 = vmul.f32 %v1988_v34, %v405_v1  ;;  %v1018_v44 = vsub.s32 3, %v1967_v61 }
  0xcd   : > { %973 = vperm.xlu1 %1669, %v1836_v21  }
  0xce   : > { %v2118_v36 = vadd.f32 %v1997_v39, %v455_v58  ;;  %v2121_v37 = vadd.f32 %v1997_v39, %v454_v6  ;;  %v626_v6 = vsub.s32 1, %v1967_v61 }
  0xcf   : > { %v420_v22 = vpop.permute.xlu1 %419  ;;  %913 = vperm.xlu0 %1691, %v1783_v8   ;;  %v415_v3 = vpop.permute.xlu0 %414 }
  0xd0   : > { %2554 = vst [vmem:[#allocation8_spill] sm:$0xff] %v2118_v36  ;;  %2555 = vst [vmem:[#allocation9_spill] sm:$0xff] %v2121_v37  ;;  %v457_v5 = vmul.f32 %v1988_v34, %v420_v22  ;;  %v456_v49 = vmul.f32 %v1988_v34, %v415_v3 }
  0xd1   : > { %1670 = vset.pattern.permute.xlu1 %v2542_v40 }
  0xd2   : > { %v2128_v1 = vadd.f32 %v1997_v39, %v457_v5  ;;  %v2131_v21 = vadd.f32 %v1997_v39, %v456_v49  ;;  %781 = vperm.xlu1 %1670, %v1847_v24   ;;  %v2146_v5 = vrot.slane %v1980_v2, %v626_v6 }
  0xd3   : > { %917 = vperm.xlu0 %1691, %v1780_v7  }
  0xd4   : > { %2556 = vst [vmem:[#allocation10_spill] sm:$0xff] %v2128_v1  ;;  %2557 = vst [vmem:[#allocation11_spill] sm:$0xff] %v2131_v21  ;;  %v2135_v58 = vpop.permute.xlu1 %501  ;;  %v498_v8 = vpop.permute.xlu0 %497 }
  0xd6   : > { %721 = vperm.xlu1 %1670, %v1780_v7  }
  0xd7   : > { %921 = vperm.xlu0 %1691, %v1791_v10  }
  0xd8   : > { %v2140_v22 = vpop.permute.xlu1 %505  ;;  %v2142_v3 = vpop.permute.xlu0 %509 }
  0xda   : > { %1671 = vset.pattern.permute.xlu1 %v2544_v33 }
  0xdb   : > { %593 = vperm.xlu1 %1671, %v1855_v26   ;;  %925 = vperm.xlu0 %1691, %v1788_v9  }
  0xdc   : > { %v2150_v49 = vpop.permute.xlu1 %513  ;;  %v518_v7 = vpop.permute.xlu0 %517 }
  0xdd   : > { %v633_v40 = vmul.f32 %v2146_v5, %v518_v7 }
  0xdf   : > { %v2154_v10 = vadd.f32 %v633_v40, %v2000_v41  ;;  %1672 = vset.pattern.permute.xlu1 %v2546_v50  ;;  %929 = vperm.xlu0 %1691, %v1799_v12   ;;  %v2560_v40 = vmov 1  }
  0xe0   : > { %v2158_v33 = vpop.permute.xlu1 %521  ;;  %977 = vperm.xlu1 %1672, %v1847_v24   ;;  %v526_v6 = vpop.permute.xlu0 %525 }
  0xe1   : > { %v635_v21 = vmul.f32 %v2146_v5, %v526_v6  ;;  %v2562_v6 = vmov 3  }
  0xe3   : > { %v2163_v1 = vadd.f32 %v635_v21, %v2011_v47  ;;  %933 = vperm.xlu0 %1691, %v1796_v11  }
  0xe4   : > { %v2166_v7 = vpop.permute.xlu1 %529  ;;  %1673 = vset.pattern.permute.xlu1 %v2560_v40  ;;  %v534_v41 = vpop.permute.xlu0 %533 }
  0xe5   : > { %2558 = vst [vmem:[#allocation12_spill] sm:$0xff] %v2163_v1  ;;  %2559 = vst [vmem:[#allocation13_spill] sm:$0xff] %v2166_v7  ;;  %v637_v50 = vmul.f32 %v2146_v5, %v534_v41  ;;  %597 = vperm.xlu1 %1673, %v1852_v25  }
  0xe7   : > { %v2172_v12 = vadd.f32 %v637_v50, %v2021_v54  ;;  %937 = vperm.xlu0 %1691, %v1807_v14   ;;  %v2564_v14 = vmov 2  }
  0xe8   : > { %v2175_v24 = vpop.permute.xlu1 %537  ;;  %v542_v47 = vpop.permute.xlu0 %541 }
  0xe9   : > { %2561 = vst [vmem:[#allocation14_spill] sm:$0xff] %v2172_v12  ;;  %v639_v21 = vmul.f32 %v2146_v5, %v542_v47  ;;  %1674 = vset.pattern.permute.xlu1 %v2562_v6 }
  0xea   : > { %981 = vperm.xlu1 %1674, %v1844_v23  }
  0xeb   : > { %v2181_v37 = vadd.f32 %v639_v21, %v2031_v60  ;;  %941 = vperm.xlu0 %1691, %v1804_v13  }
  0xec   : > { %v2184_v41 = vpop.permute.xlu1 %545  ;;  %v550_v50 = vpop.permute.xlu0 %549 }
  0xed   : > { %2563 = vst [vmem:[#allocation15_spill] sm:$0xff] %v2181_v37  ;;  %v641_v54 = vmul.f32 %v2146_v5, %v550_v50 }
  0xee   : > { %1675 = vset.pattern.permute.xlu1 %v2564_v14 }
  0xef   : > { %v2189_v36 = vadd.f32 %v641_v54, %v2042_v38  ;;  %789 = vperm.xlu1 %1675, %v1855_v26   ;;  %1009 = vperm.xlu0 %1691, %v1879_v32  }
  0xf0   : > { %v2193_v23 = vpop.permute.xlu1 %553  ;;  %v558_v60 = vpop.permute.xlu0 %557 }
  0xf1   : > { %2565 = vst [vmem:[#allocation16_spill] sm:$0xff] %v2189_v36  ;;  %v643_v47 = vmul.f32 %v2146_v5, %v558_v60  ;;  %v426_v36 = vmul.f32 %v1988_v34, %v1972_v63  ;;  %v822_v60 = vsub.s32 2, %v1967_v61  ;;  %v442_v63 = vmul.f32 %v1988_v34, %v2061_v56 }
  0xf3   : > { %v2197_v21 = vadd.f32 %v643_v47, %v2053_v51  ;;  %729 = vperm.xlu1 %1675, %v1788_v9   ;;  %v464_v47 = vadd.f32 %v1997_v39, %v426_v36  ;;  %v2216_v37 = vrot.slane %v1980_v2, %v822_v60  ;;  %v427_v60 = vmul.f32 %v1988_v34, %v1984_v18 }
  0xf4   : > { %v562_v50 = vpop.permute.xlu1 %561  ;;  %v2200_v46 = vpop.permute.xlu0 %565  ;;  %v480_v61 = vadd.f32 %v1997_v39, %v442_v63  ;;  %v629_v18 = vmul.f32 %v2146_v5, %v2135_v58 }
  0xf5   : > { %2566 = vst [vmem:[#allocation17_spill] sm:$0xff] %v2197_v21  ;;  %v628_v21 = vmul.f32 %v2146_v5, %v498_v8  ;;  %v2227_v8 = vrot.slane %v1980_v2, %v1018_v44  ;;  %v644_v56 = vmul.f32 %v2146_v5, %v562_v50  ;;  %v465_v44 = vadd.f32 %v1997_v39, %v427_v60 }
  0xf7   : > { %1676 = vset.pattern.permute.xlu1 %v2560_v40 }
  0xf8   : > { %601 = vperm.xlu1 %1676, %v1863_v28   ;;  %v2204_v38 = vpop.permute.xlu0 %569 }
  0xf9   : > { %v694_v54 = vpop.permute.xlu1 %693 }
  0xfa   : > { %v824_v36 = vmul.f32 %v2216_v37, %v694_v54  ;;  %v676_v54 = vadd.f32 %v644_v56, %v480_v61 }
  0xfc   : > { %1677 = vset.pattern.permute.xlu1 %v2562_v6  ;;  %v2210_v51 = vpop.permute.xlu0 %573 }
  0xfd   : > { %985 = vperm.xlu1 %1677, %v1855_v26   ;;  %v698_v9 = vpop.permute.xlu1 %697  ;;  %v660_v26 = vadd.f32 %v628_v21, %v464_v47 }
  0xfe   : > { %v825_v55 = vmul.f32 %v2216_v37, %v698_v9 }
  0xff   : > { %v856_v2 = vadd.f32 %v824_v36, %v660_v26 }
 0x101   : > { %1678 = vset.pattern.permute.xlu1 %v2560_v40  ;;  %v2222_v20 = vpop.permute.xlu1 %761  ;;  %v758_v12 = vpop.permute.xlu0 %757 }
 0x102   : > { %605 = vperm.xlu1 %1678, %v1860_v27   ;;  %v840_v1 = vmul.f32 %v2216_v37, %v758_v12 }
 0x104   : > { %v872_v12 = vadd.f32 %v840_v1, %v676_v54  ;;  %v638_v54 = vmul.f32 %v2146_v5, %v2175_v24  ;;  %v640_v24 = vmul.f32 %v2146_v5, %v2184_v41  ;;  %v642_v41 = vmul.f32 %v2146_v5, %v2193_v23 }
 0x105   : > { %v2233_v59 = vpop.permute.xlu0 %705  ;;  %v646_v23 = vmul.f32 %v2146_v5, %v2204_v38 }
 0x106   : > { %1679 = vset.pattern.permute.xlu1 %v2562_v6  ;;  %v890_v45 = vpop.permute.xlu1 %889 }
 0x107   : > { %v1020_v21 = vmul.f32 %v2227_v8, %v890_v45  ;;  %989 = vperm.xlu1 %1679, %v1852_v25   ;;  %v661_v25 = vadd.f32 %v629_v18, %v465_v44 }
 0x109   : > { %v2242_v47 = vpop.permute.xlu0 %709  ;;  %v1052_v50 = vadd.f32 %v1020_v21, %v856_v2  ;;  %v857_v60 = vadd.f32 %v825_v55, %v661_v25 }
 0x10a   : > { %v954_v63 = vpop.permute.xlu1 %953 }
 0x10b   : > { %v1036_v7 = vmul.f32 %v2227_v8, %v954_v63  ;;  %1680 = vset.pattern.permute.xlu1 %v2564_v14  ;;  %v1084_v45 = vmax.f32 %v1052_v50, 0.0 }
 0x10c   : > { %797 = vperm.xlu1 %1680, %v1863_v28  }
 0x10d   : > { %1545 = vmatprep.mubr.f32.mxu0 %v1084_v45  ;;  %v2248_v26 = vpop.permute.xlu0 %777  ;;  %v1068_v58 = vadd.f32 %v1036_v7, %v872_v12  ;;  %v670_v45 = vadd.f32 %v638_v54, %v2034_v0  ;;  %v672_v0 = vadd.f32 %v640_v24, %v2045_v43  ;;  %v674_v54 = vadd.f32 %v642_v41, %v2056_v52 }
 0x10e   : > { %v894_v36 = vpop.permute.xlu1 %893  ;;  %v645_v24 = vmul.f32 %v2146_v5, %v2200_v46  ;;  %v445_v52 = vmul.f32 %v1988_v34, %v2066_v19  ;;  %v647_v41 = vmul.f32 %v2146_v5, %v2210_v51 }
 0x10f   : > { %v1021_v61 = vmul.f32 %v2227_v8, %v894_v36  ;;  %v1100_v56 = vmax.f32 %v1068_v58, 0.0 }
 0x110   : > { %737 = vperm.xlu1 %1680, %v1796_v11  }
 0x111   : > { %v1053_v9 = vadd.f32 %v1021_v61, %v857_v60  ;;  %1569 = vmatprep.mubr.f32.mxu1 %v1100_v56  ;;  %v2252_v21 = vpop.permute.xlu0 %717 }
 0x113   : > { %v1085_v2 = vmax.f32 %v1053_v9, 0.0  ;;  %v2254_v1 = vpop.permute.xlu1 %701 }
 0x114   : > { %1681 = vset.pattern.permute.xlu1 %v2560_v40 }
 0x115   : > { %609 = vperm.xlu1 %1681, %v1871_v30   ;;  %1546 = vmatmul.mubr.f32.vlgmr.msra.gmra.mrb[0].mxu0 %v1085_v2  ;;  %v2258_v7 = vpop.permute.xlu0 %785  ;;  %v444_v2 = vmul.f32 %v1988_v34, %v2068_v57 }
 0x117   : > { %v766_v55 = vpop.permute.xlu1 %765 }
 0x119   : > { %1682 = vset.pattern.permute.xlu1 %v2562_v6  ;;  %v2261_v44 = vpop.permute.xlu0 %725 }
 0x11a   : > { %993 = vperm.xlu1 %1682, %v1863_v28  }
 0x11b   : > { %v770_v11 = vpop.permute.xlu1 %769 }
 0x11d   : > { %v2264_v18 = vpop.permute.xlu0 %793 }
 0x11e   : > { %1683 = vset.pattern.permute.xlu1 %v2560_v40 }
 0x11f   : > { %613 = vperm.xlu1 %1683, %v1868_v29  }
 0x120   : > { %v2270_v50 = vpop.permute.xlu1 %577 }
 0x121   : > { %v734_v63 = vpop.permute.xlu0 %733 }
 0x122   : > { %v834_v12 = vmul.f32 %v2216_v37, %v734_v63 }
 0x123   : > { %1684 = vset.pattern.permute.xlu1 %v2562_v6 }
 0x124   : > { %v2275_v28 = vadd.f32 %v834_v12, %v670_v45  ;;  %997 = vperm.xlu1 %1684, %v1860_v27   ;;  %v482_v45 = vadd.f32 %v1997_v39, %v444_v2 }
 0x125   : > { %v962_v25 = vpop.permute.xlu1 %961  ;;  %v2278_v58 = vpop.permute.xlu0 %801 }
 0x126   : > { %v678_v46 = vadd.f32 %v646_v23, %v482_v45  ;;  %v1038_v19 = vmul.f32 %v2227_v8, %v962_v25  ;;  %v826_v45 = vmul.f32 %v2216_v37, %v2254_v1 }
 0x128   : > { %1685 = vset.pattern.permute.xlu1 %v2564_v14 }
 0x129   : > { %805 = vperm.xlu1 %1685, %v1871_v30   ;;  %v742_v36 = vpop.permute.xlu0 %741 }
 0x12a   : > { %v836_v60 = vmul.f32 %v2216_v37, %v742_v36  ;;  %v2286_v61 = vpop.permute.xlu1 %581 }
 0x12c   : > { %v2288_v56 = vadd.f32 %v836_v60, %v672_v0  ;;  %v842_v0 = vmul.f32 %v2216_v37, %v766_v55  ;;  %v841_v60 = vmul.f32 %v2216_v37, %v2222_v20  ;;  %v429_v55 = vmul.f32 %v1988_v34, %v1982_v4 }
 0x12d   : > { %745 = vperm.xlu1 %1685, %v1804_v13   ;;  %v2291_v27 = vpop.permute.xlu0 %809  ;;  %v443_v13 = vmul.f32 %v1988_v34, %v2059_v53  ;;  %v428_v53 = vmul.f32 %v1988_v34, %v1969_v62  ;;  %v630_v62 = vmul.f32 %v2146_v5, %v2140_v22  ;;  %v446_v20 = vmul.f32 %v1988_v34, %v2073_v16 }
 0x12e   : > { %v631_v22 = vmul.f32 %v2146_v5, %v2142_v3  ;;  %v467_v1 = vadd.f32 %v1997_v39, %v429_v55  ;;  %v827_v3 = vmul.f32 %v2216_v37, %v2233_v59 }
 0x12f   : > { %v966_v9 = vpop.permute.xlu1 %965  ;;  %v481_v38 = vadd.f32 %v1997_v39, %v443_v13  ;;  %v466_v51 = vadd.f32 %v1997_v39, %v428_v53 }
 0x130   : > { %v1039_v34 = vmul.f32 %v2227_v8, %v966_v9 }
 0x131   : > { %1686 = vset.pattern.permute.xlu1 %v2560_v40  ;;  %v750_v43 = vpop.permute.xlu0 %749  ;;  %v662_v16 = vadd.f32 %v630_v62, %v466_v51 }
 0x132   : > { %v838_v63 = vmul.f32 %v2216_v37, %v750_v43  ;;  %617 = vperm.xlu1 %1686, %v1879_v32   ;;  %v677_v43 = vadd.f32 %v645_v24, %v481_v38 }
 0x134   : > { %v2306_v12 = vadd.f32 %v838_v63, %v674_v54  ;;  %v774_v57 = vpop.permute.xlu1 %773  ;;  %v483_v54 = vadd.f32 %v1997_v39, %v445_v52  ;;  %v843_v63 = vmul.f32 %v2216_v37, %v770_v11  ;;  %v873_v25 = vadd.f32 %v841_v60, %v677_v43 }
 0x135   : > { %v2310_v36 = vpop.permute.xlu0 %817  ;;  %v648_v11 = vmul.f32 %v2146_v5, %v2270_v50  ;;  %v858_v60 = vadd.f32 %v826_v45, %v662_v16  ;;  %v844_v9 = vmul.f32 %v2216_v37, %v774_v57  ;;  %v632_v50 = vmul.f32 %v2146_v5, %v2150_v49 }
 0x136   : > { %1687 = vset.pattern.permute.xlu1 %v2562_v6  ;;  %v679_v23 = vadd.f32 %v647_v41, %v483_v54  ;;  %v828_v57 = vmul.f32 %v2216_v37, %v2242_v47 }
 0x137   : > { %1001 = vperm.xlu1 %1687, %v1871_v30   ;;  %v874_v30 = vadd.f32 %v842_v0, %v678_v46  ;;  %v664_v51 = vadd.f32 %v632_v50, %v2003_v42  ;;  %v2567_v50 = vld [vmem:[#allocation13_spill] sm:$0xff] }
 0x138   : > { %v714_v2 = vpop.permute.xlu1 %713  ;;  %v875_v53 = vadd.f32 %v843_v63, %v679_v23 }
 0x139   : > { %v1070_v24 = vadd.f32 %v1038_v19, %v874_v30  ;;  %v663_v19 = vadd.f32 %v631_v22, %v467_v1  ;;  %v860_v47 = vadd.f32 %v828_v57, %v664_v51  ;;  %v829_v23 = vmul.f32 %v2216_v37, %v714_v2  ;;  %v1694_v57 = vld [vmem:[%s1753_s24 + $0x78] sm:$0xff] }
 0x13a   : > { %v958_v13 = vpop.permute.xlu0 %957  ;;  %v1071_v43 = vadd.f32 %v1039_v34, %v875_v53 }
 0x13b   : > { %v1037_v4 = vmul.f32 %v2227_v8, %v958_v13  ;;  %1688 = vset.pattern.permute.xlu1 %v2560_v40  ;;  %v484_v40 = vadd.f32 %v1997_v39, %v446_v20  ;;  %v1102_v62 = vmax.f32 %v1070_v24, 0.0  ;;  %v859_v59 = vadd.f32 %v827_v3, %v663_v19  ;;  %v1693_v19 = vld [vmem:[%s1753_s24 + $0x70] sm:$0xff] }
 0x13c   : > { %621 = vperm.xlu1 %1688, %v1876_v31  }
 0x13d   : > { %v1069_v52 = vadd.f32 %v1037_v4, %v873_v25  ;;  %v2344_v0 = vpop.permute.xlu1 %585  ;;  %v680_v39 = vadd.f32 %v648_v11, %v484_v40  ;;  %v1103_v25 = vmax.f32 %v1071_v43, 0.0  ;;  %v847_v11 = vmul.f32 %v2216_v37, %v2258_v7 }
 0x13e   : > { %v898_v38 = vpop.permute.xlu0 %897  ;;  %v861_v7 = vadd.f32 %v829_v23, %v2154_v10 }
 0x13f   : > { %v1101_v46 = vmax.f32 %v1069_v52, 0.0  ;;  %v1022_v41 = vmul.f32 %v2227_v8, %v898_v38  ;;  %v876_v30 = vadd.f32 %v844_v9, %v680_v39  ;;  %v845_v52 = vmul.f32 %v2216_v37, %v2248_v26 }
 0x140   : > { %1689 = vset.pattern.permute.xlu1 %v2562_v6 }
 0x141   : > { %v1054_v55 = vadd.f32 %v1022_v41, %v858_v60  ;;  %1005 = vperm.xlu1 %1689, %v1868_v29   ;;  %1570 = vmatmul.mubr.f32.vlgmr.msra.gmra.mrb[0].mxu1 %v1101_v46  ;;  %v649_v29 = vmul.f32 %v2146_v5, %v2286_v61  ;;  %v634_v61 = vmul.f32 %v2146_v5, %v2158_v33 }
 0x142   : > { %v970_v54 = vpop.permute.xlu1 %969  ;;  %1572 = vmatprep.mubr.f32.mxu1 %v1102_v62  ;;  %v902_v20 = vpop.permute.xlu0 %901  ;;  %v830_v33 = vmul.f32 %v2216_v37, %v2252_v21  ;;  %v636_v62 = vmul.f32 %v2146_v5, %v2567_v50 }
 0x143   : > { %v1086_v63 = vmax.f32 %v1054_v55, 0.0  ;;  %v1040_v49 = vmul.f32 %v2227_v8, %v970_v54  ;;  %v1023_v13 = vmul.f32 %v2227_v8, %v902_v20  ;;  %v2568_v54 = vld [vmem:[#allocation2_spill] sm:$0xff] }
 0x144   : > { %v668_v20 = vadd.f32 %v636_v62, %v2568_v54 }
 0x145   : > { %v1072_v45 = vadd.f32 %v1040_v49, %v876_v30  ;;  %v1055_v4 = vadd.f32 %v1023_v13, %v859_v59  ;;  %1690 = vset.pattern.permute.xlu1 %v2564_v14  ;;  %1548 = vmatprep.mubr.f32.mxu0 %v1086_v63 }
 0x146   : > { %1573 = vmatmul.mubr.f32.gmra.mrb[2].mxu1 %v1103_v25  ;;  %813 = vperm.xlu1 %1690, %v1879_v32   ;;  %v906_v22 = vpop.permute.xlu0 %905  ;;  %v681_v32 = vadd.f32 %v649_v29, %v2078_v35  ;;  %v666_v35 = vadd.f32 %v634_v61, %v2014_v48  ;;  %v2569_v29 = vld [vmem:[#allocation12_spill] sm:$0xff] }
 0x147   : > { %v1104_v24 = vmax.f32 %v1072_v45, 0.0  ;;  %v1087_v34 = vmax.f32 %v1055_v4, 0.0  ;;  %v1024_v42 = vmul.f32 %v2227_v8, %v906_v22  ;;  %v590_v16 = vpop.permute.xlu1 %589  ;;  %v650_v4 = vmul.f32 %v2146_v5, %v2344_v0 }
 0x148   : > { %v651_v14 = vmul.f32 %v2146_v5, %v590_v16  ;;  %v877_v9 = vadd.f32 %v845_v52, %v681_v32  ;;  %v862_v21 = vadd.f32 %v830_v33, %v666_v35  ;;  %v849_v0 = vmul.f32 %v2216_v37, %v2264_v18 }
 0x149   : > { %v1056_v1 = vadd.f32 %v1024_v42, %v860_v47  ;;  %1549 = vmatmul.mubr.f32.gmra.mrb[2].mxu0 %v1087_v34  ;;  %1575 = vmatprep.mubr.f32.mxu1 %v1104_v24  ;;  %v2570_v42 = vld [vmem:[#allocation3_spill] sm:$0xff] }
 0x14a   : > { %v683_v2 = vadd.f32 %v651_v14, %v2085_v17  ;;  %753 = vperm.xlu1 %1690, %v1812_v15   ;;  %v910_v40 = vpop.permute.xlu0 %909  ;;  %v682_v16 = vadd.f32 %v650_v4, %v2570_v42 }
 0x14b   : > { %v1088_v3 = vmax.f32 %v1056_v1, 0.0  ;;  %v1025_v53 = vmul.f32 %v2227_v8, %v910_v40 }
 0x14c   : > { %v974_v26 = vpop.permute.xlu1 %973  ;;  %v879_v38 = vadd.f32 %v847_v11, %v683_v2  ;;  %v2571_v2 = vld [vmem:[#allocation4_spill] sm:$0xff] }
 0x14d   : > { %v1057_v60 = vadd.f32 %v1025_v53, %v861_v7  ;;  %v1041_v17 = vmul.f32 %v2227_v8, %v974_v26  ;;  %1551 = vmatprep.mubr.f32.mxu0 %v1088_v3 }
 0x14e   : > { %1692 = vset.pattern.permute.xlu1 %v2562_v6  ;;  %v914_v15 = vpop.permute.xlu0 %913  ;;  %v832_v6 = vmul.f32 %v2216_v37, %v2261_v44 }
 0x14f   : > { %v1089_v46 = vmax.f32 %v1057_v60, 0.0  ;;  %v1073_v10 = vadd.f32 %v1041_v17, %v877_v9  ;;  %v1026_v41 = vmul.f32 %v2227_v8, %v914_v15  ;;  %945 = vperm.xlu1 %1692, %v1693_v19  }
 0x150   : > { %v864_v51 = vadd.f32 %v832_v6, %v668_v20 }
 0x151   : > { %v1105_v48 = vmax.f32 %v1073_v10, 0.0  ;;  %v1058_v43 = vadd.f32 %v1026_v41, %v862_v21  ;;  %v782_v39 = vpop.permute.xlu1 %781  ;;  %1552 = vmatmul.mubr.f32.gmra.mrb[4].mxu0 %v1089_v46  ;;  %v2572_v46 = vld [vmem:[#allocation14_spill] sm:$0xff] }
 0x152   : > { %v918_v55 = vpop.permute.xlu0 %917  ;;  %v846_v23 = vmul.f32 %v2216_v37, %v782_v39  ;;  %v2573_v39 = vld [vmem:[#allocation5_spill] sm:$0xff] }
 0x153   : > { %v1090_v59 = vmax.f32 %v1058_v43, 0.0  ;;  %949 = vperm.xlu1 %1692, %v1694_v57   ;;  %1576 = vmatmul.mubr.f32.gmra.mrb[4].mxu1 %v1105_v48  ;;  %v1027_v63 = vmul.f32 %v2227_v8, %v918_v55 }
 0x154   : > { %v878_v11 = vadd.f32 %v846_v23, %v682_v16 }
 0x155   : > { %v722_v30 = vpop.permute.xlu1 %721  ;;  %1554 = vmatprep.mubr.f32.mxu0 %v1090_v59 }
 0x156   : > { %v831_v49 = vmul.f32 %v2216_v37, %v722_v30  ;;  %v922_v13 = vpop.permute.xlu0 %921 }
 0x157   : > { %v1028_v25 = vmul.f32 %v2227_v8, %v922_v13  ;;  %1013 = vperm.xlu1 %1692, %v1876_v31  }
 0x158   : > { %v863_v44 = vadd.f32 %v831_v49, %v2569_v29  ;;  %v2574_v49 = vld [vmem:[#allocation6_spill] sm:$0xff] }
 0x159   : > { %v1060_v45 = vadd.f32 %v1028_v25, %v864_v51 }
 0x15a   : > { %v594_v47 = vpop.permute.xlu1 %593  ;;  %v1059_v22 = vadd.f32 %v1027_v63, %v863_v44  ;;  %v926_v33 = vpop.permute.xlu0 %925  ;;  %v851_v63 = vmul.f32 %v2216_v37, %v2278_v58  ;;  %v2575_v58 = vld [vmem:[#allocation15_spill] sm:$0xff] }
 0x15b   : > { %v1092_v34 = vmax.f32 %v1060_v45, 0.0  ;;  %v1029_v18 = vmul.f32 %v2227_v8, %v926_v33  ;;  %v652_v19 = vmul.f32 %v2146_v5, %v594_v47 }
 0x15c   : > { %v1091_v24 = vmax.f32 %v1059_v22, 0.0 }
 0x15d   : > { %v684_v55 = vadd.f32 %v652_v19, %v2573_v39 }
 0x15e   : > { %1555 = vmatmul.mubr.f32.gmra.mrb[6].mxu0 %v1091_v24  ;;  %v930_v9 = vpop.permute.xlu0 %929 }
 0x15f   : > { %v978_v61 = vpop.permute.xlu1 %977  ;;  %1557 = vmatprep.mubr.f32.mxu0 %v1092_v34  ;;  %v1030_v17 = vmul.f32 %v2227_v8, %v930_v9 }
 0x160   : > { %v1042_v31 = vmul.f32 %v2227_v8, %v978_v61 }
 0x161   : > { %v1062_v41 = vadd.f32 %v1030_v17, %v2275_v28 }
 0x162   : > { %v1074_v14 = vadd.f32 %v1042_v31, %v878_v11  ;;  %v934_v51 = vpop.permute.xlu0 %933 }
 0x163   : > { %v1094_v43 = vmax.f32 %v1062_v41, 0.0  ;;  %v1031_v34 = vmul.f32 %v2227_v8, %v934_v51  ;;  %v855_v51 = vmul.f32 %v2216_v37, %v2310_v36 }
 0x164   : > { %v1106_v52 = vmax.f32 %v1074_v14, 0.0  ;;  %v598_v32 = vpop.permute.xlu1 %597 }
 0x165   : > { %v653_v1 = vmul.f32 %v2146_v5, %v598_v32 }
 0x166   : > { %1578 = vmatprep.mubr.f32.mxu1 %v1106_v52  ;;  %v938_v22 = vpop.permute.xlu0 %937 }
 0x167   : > { %v685_v40 = vadd.f32 %v653_v1, %v2571_v2  ;;  %v1032_v23 = vmul.f32 %v2227_v8, %v938_v22  ;;  %v2576_v1 = vld [vmem:[#allocation7_spill] sm:$0xff] }
 0x169   : > { %v982_v7 = vpop.permute.xlu1 %981  ;;  %v881_v3 = vadd.f32 %v849_v0, %v685_v40  ;;  %v1064_v61 = vadd.f32 %v1032_v23, %v2288_v56 }
 0x16a   : > { %v1043_v53 = vmul.f32 %v2227_v8, %v982_v7 }
 0x16b   : > { %v1096_v0 = vmax.f32 %v1064_v61, 0.0 }
 0x16c   : > { %v1075_v26 = vadd.f32 %v1043_v53, %v879_v38 }
 0x16e   : > { %v1107_v35 = vmax.f32 %v1075_v26, 0.0  ;;  %v790_v60 = vpop.permute.xlu1 %789 }
 0x16f   : > { %v848_v38 = vmul.f32 %v2216_v37, %v790_v60  ;;  %v2577_v60 = vld [vmem:[#allocation8_spill] sm:$0xff] }
 0x170   : > { %1579 = vmatmul.mubr.f32.gmra.mrb[6].mxu1 %v1107_v35  ;;  %v853_v35 = vmul.f32 %v2216_v37, %v2291_v27 }
 0x171   : > { %v880_v59 = vadd.f32 %v848_v38, %v684_v55  ;;  %v2578_v38 = vld [vmem:[#allocation16_spill] sm:$0xff] }
 0x172   : > { %v730_v15 = vpop.permute.xlu1 %729 }
 0x173   : > { %v833_v21 = vmul.f32 %v2216_v37, %v730_v15 }
 0x175   : > { %v865_v10 = vadd.f32 %v833_v21, %v2572_v46 }
 0x177   : > { %v602_v50 = vpop.permute.xlu1 %601  ;;  %v1061_v62 = vadd.f32 %v1029_v18, %v865_v10 }
 0x178   : > { %v654_v11 = vmul.f32 %v2146_v5, %v602_v50  ;;  %v942_v50 = vpop.permute.xlu0 %941 }
 0x179   : > { %v1093_v48 = vmax.f32 %v1061_v62, 0.0  ;;  %v1033_v62 = vmul.f32 %v2227_v8, %v942_v50 }
 0x17a   : > { %v686_v2 = vadd.f32 %v654_v11, %v2576_v1 }
 0x17b   : > { %1558 = vmatmul.mubr.f32.gmra.mrb[8].mxu0 %v1093_v48 }
 0x17c   : > { %v986_v6 = vpop.permute.xlu1 %985  ;;  %1560 = vmatprep.mubr.f32.mxu0 %v1094_v43  ;;  %v1010_v23 = vpop.permute.xlu0 %1009 }
 0x17d   : > { %v1044_v57 = vmul.f32 %v2227_v8, %v986_v6  ;;  %v1050_v61 = vmul.f32 %v2227_v8, %v1010_v23 }
 0x17f   : > { %v1076_v54 = vadd.f32 %v1044_v57, %v880_v59  ;;  %v2579_v59 = vld [vmem:[#allocation9_spill] sm:$0xff] }
 0x181   : > { %v1108_v20 = vmax.f32 %v1076_v54, 0.0  ;;  %v606_v30 = vpop.permute.xlu1 %605 }
 0x182   : > { %v655_v28 = vmul.f32 %v2146_v5, %v606_v30 }
 0x183   : > { %1581 = vmatprep.mubr.f32.mxu1 %v1108_v20 }
 0x184   : > { %v687_v13 = vadd.f32 %v655_v28, %v2574_v49 }
 0x186   : > { %v990_v25 = vpop.permute.xlu1 %989  ;;  %v883_v29 = vadd.f32 %v851_v63, %v687_v13 }
 0x187   : > { %v1045_v44 = vmul.f32 %v2227_v8, %v990_v25  ;;  %v2580_v25 = vld [vmem:[#allocation10_spill] sm:$0xff] }
 0x189   : > { %v1077_v45 = vadd.f32 %v1045_v44, %v881_v3 }
 0x18b   : > { %v1109_v4 = vmax.f32 %v1077_v45, 0.0  ;;  %v798_v47 = vpop.permute.xlu1 %797 }
 0x18c   : > { %v850_v52 = vmul.f32 %v2216_v37, %v798_v47 }
 0x18d   : > { %1582 = vmatmul.mubr.f32.gmra.mrb[8].mxu1 %v1109_v4 }
 0x18e   : > { %v882_v33 = vadd.f32 %v850_v52, %v686_v2  ;;  %v2582_v2 = vld [vmem:[#allocation17_spill] sm:$0xff] }
 0x18f   : > { %v738_v24 = vpop.permute.xlu1 %737 }
 0x190   : > { %v835_v42 = vmul.f32 %v2216_v37, %v738_v24 }
 0x192   : > { %v867_v16 = vadd.f32 %v835_v42, %v2575_v58  ;;  %v2581_v42 = vld [vmem:[#allocation11_spill] sm:$0xff] }
 0x194   : > { %v610_v31 = vpop.permute.xlu1 %609  ;;  %v1063_v14 = vadd.f32 %v1031_v34, %v867_v16 }
 0x195   : > { %v656_v27 = vmul.f32 %v2146_v5, %v610_v31 }
 0x196   : > { %v1095_v32 = vmax.f32 %v1063_v14, 0.0 }
 0x197   : > { %v688_v57 = vadd.f32 %v656_v27, %v2579_v59 }
 0x198   : > { %1561 = vmatmul.mubr.f32.gmra.mrb[10].mxu0 %v1095_v32 }
 0x199   : > { %v994_v40 = vpop.permute.xlu1 %993  ;;  %1563 = vmatprep.mubr.f32.mxu0 %v1096_v0 }
 0x19a   : > { %v1046_v7 = vmul.f32 %v2227_v8, %v994_v40 }
 0x19c   : > { %v1078_v3 = vadd.f32 %v1046_v7, %v882_v33 }
 0x19e   : > { %v1110_v53 = vmax.f32 %v1078_v3, 0.0  ;;  %v614_v26 = vpop.permute.xlu1 %613 }
 0x19f   : > { %v657_v56 = vmul.f32 %v2146_v5, %v614_v26 }
 0x1a0   : > { %1584 = vmatprep.mubr.f32.mxu1 %v1110_v53 }
 0x1a1   : > { %v689_v9 = vadd.f32 %v657_v56, %v2577_v60 }
 0x1a3   : > { %v998_v17 = vpop.permute.xlu1 %997  ;;  %v885_v15 = vadd.f32 %v853_v35, %v689_v9 }
 0x1a4   : > { %v1047_v18 = vmul.f32 %v2227_v8, %v998_v17 }
 0x1a6   : > { %v1079_v21 = vadd.f32 %v1047_v18, %v883_v29 }
 0x1a8   : > { %v1111_v46 = vmax.f32 %v1079_v21, 0.0  ;;  %v806_v10 = vpop.permute.xlu1 %805 }
 0x1a9   : > { %v852_v55 = vmul.f32 %v2216_v37, %v806_v10 }
 0x1aa   : > { %1585 = vmatmul.mubr.f32.gmra.mrb[10].mxu1 %v1111_v46 }
 0x1ab   : > { %v884_v20 = vadd.f32 %v852_v55, %v688_v57 }
 0x1ac   : > { %v746_v41 = vpop.permute.xlu1 %745 }
 0x1ad   : > { %v837_v19 = vmul.f32 %v2216_v37, %v746_v41 }
 0x1af   : > { %v869_v48 = vadd.f32 %v837_v19, %v2578_v38 }
 0x1b1   : > { %v618_v43 = vpop.permute.xlu1 %617  ;;  %v1065_v39 = vadd.f32 %v1033_v62, %v869_v48 }
 0x1b2   : > { %v658_v47 = vmul.f32 %v2146_v5, %v618_v43 }
 0x1b3   : > { %v1097_v6 = vmax.f32 %v1065_v39, 0.0 }
 0x1b4   : > { %v690_v58 = vadd.f32 %v658_v47, %v2581_v42 }
 0x1b5   : > { %1564 = vmatmul.mubr.f32.gmra.mrb[12].mxu0 %v1097_v6 }
 0x1b6   : > { %v1002_v54 = vpop.permute.xlu1 %1001 }
 0x1b7   : > { %v1048_v30 = vmul.f32 %v2227_v8, %v1002_v54 }
 0x1b9   : > { %v1080_v28 = vadd.f32 %v1048_v30, %v884_v20 }
 0x1bb   : > { %v1112_v63 = vmax.f32 %v1080_v28, 0.0  ;;  %v622_v49 = vpop.permute.xlu1 %621 }
 0x1bc   : > { %v659_v13 = vmul.f32 %v2146_v5, %v622_v49 }
 0x1bd   : > { %1587 = vmatprep.mubr.f32.mxu1 %v1112_v63 }
 0x1be   : > { %v691_v29 = vadd.f32 %v659_v13, %v2580_v25 }
 0x1c0   : > { %v1006_v44 = vpop.permute.xlu1 %1005  ;;  %v887_v45 = vadd.f32 %v855_v51, %v691_v29 }
 0x1c1   : > { %v1049_v4 = vmul.f32 %v2227_v8, %v1006_v44 }
 0x1c3   : > { %v1081_v22 = vadd.f32 %v1049_v4, %v885_v15 }
 0x1c5   : > { %v1113_v24 = vmax.f32 %v1081_v22, 0.0  ;;  %v814_v34 = vpop.permute.xlu1 %813 }
 0x1c6   : > { %v854_v16 = vmul.f32 %v2216_v37, %v814_v34 }
 0x1c7   : > { %1588 = vmatmul.mubr.f32.gmra.mrb[12].mxu1 %v1113_v24 }
 0x1c8   : > { %v886_v36 = vadd.f32 %v854_v16, %v690_v58 }
 0x1c9   : > { %v754_v11 = vpop.permute.xlu1 %753 }
 0x1ca   : > { %v1082_v31 = vadd.f32 %v1050_v61, %v886_v36  ;;  %v839_v32 = vmul.f32 %v2216_v37, %v754_v11 }
 0x1cc   : > { %v1114_v14 = vmax.f32 %v1082_v31, 0.0  ;;  %v871_v40 = vadd.f32 %v839_v32, %v2582_v2 }
 0x1ce   : > { %v946_v52 = vpop.permute.xlu1 %945  ;;  %1590 = vmatprep.mubr.f32.mxu1 %v1114_v14 }
 0x1cf   : > { %v1034_v5 = vmul.f32 %v2227_v8, %v946_v52 }
 0x1d1   : > { %v1066_v0 = vadd.f32 %v1034_v5, %v2306_v12  ;;  %v2460_v12 = vld [vmem:[%s2540_s4] ss:$0 sm:$0xff] }
 0x1d2   : > { %v950_v1 = vpop.permute.xlu1 %949 }
 0x1d3   : > { %v1098_v33 = vmax.f32 %v1066_v0, 0.0  ;;  %v1035_v7 = vmul.f32 %v2227_v8, %v950_v1 }
 0x1d5   : > { %v1067_v3 = vadd.f32 %v1035_v7, %v871_v40  ;;  %1566 = vmatprep.mubr.f32.mxu0 %v1098_v33 }
 0x1d6   : > { %v1014_v53 = vpop.permute.xlu1 %1013 }
 0x1d7   : > { %v1099_v26 = vmax.f32 %v1067_v3, 0.0  ;;  %v1051_v56 = vmul.f32 %v2227_v8, %v1014_v53 }
 0x1d9   : > { %v1083_v35 = vadd.f32 %v1051_v56, %v887_v45  ;;  %1567 = vmatmul.mubr.f32.gmra.mrb[14].mxu0 %v1099_v26 }
 0x1db   : > { %v1115_v37 = vmax.f32 %v1083_v35, 0.0 }
 0x1dd   : > { %1591 = vmatmul.mubr.f32.gmra.mrb[14].mxu1 %v1115_v37 }
 0x1e8   : > { %v1547_v8 = vpop.f32.mrb[0].mxu0 }
 0x1e9   : > { %v1211_v60 = vadd.f32 %v1547_v8, %v2460_v12  ;;  %v1205_v9 = vpop.f32.mrb[1].mxu0 }
 0x1ea   : > { %v1206_v17 = vadd.f32 %v2460_v12, %v1205_v9 }
 0x1eb   : > { %1365 = vst [vmem:[%s2467_s19 + $0x8] sm:$0xff] %v1211_v60 }
 0x1ec   : > { %1364 = vst [vmem:[%s2467_s19] sm:$0xff] %v1206_v17 }
 0x214   : > { %v1571_v15 = vpop.f32.mrb[0].mxu1 }
 0x215   : > { %v1291_v18 = vadd.f32 %v1571_v15, %v2460_v12  ;;  %v1285_v21 = vpop.f32.mrb[1].mxu1 }
 0x216   : > { %v1286_v46 = vadd.f32 %v2460_v12, %v1285_v21 }
 0x217   : > { %1381 = vst [vmem:[%s2467_s19 + $0x88] sm:$0xff] %v1291_v18 }
 0x218   : > { %1380 = vst [vmem:[%s2467_s19 + $0x80] sm:$0xff] %v1286_v46 }
 0x219   : > { %v1574_v10 = vpop.f32.mrb[2].mxu1 }
 0x21a   : > { %v1301_v41 = vadd.f32 %v1574_v10, %v2460_v12  ;;  %v1295_v19 = vpop.f32.mrb[3].mxu1 }
 0x21b   : > { %v1296_v50 = vadd.f32 %v2460_v12, %v1295_v19 }
 0x21c   : > { %1383 = vst [vmem:[%s2467_s19 + $0x98] sm:$0xff] %v1301_v41  ;;  %v1550_v62 = vpop.f32.mrb[2].mxu0 }
 0x21d   : > { %1382 = vst [vmem:[%s2467_s19 + $0x90] sm:$0xff] %v1296_v50  ;;  %v1221_v38 = vadd.f32 %v1550_v62, %v2460_v12  ;;  %v1215_v48 = vpop.f32.mrb[3].mxu0 }
 0x21e   : > { %v1216_v27 = vadd.f32 %v2460_v12, %v1215_v48 }
 0x21f   : > { %1367 = vst [vmem:[%s2467_s19 + $0x18] sm:$0xff] %v1221_v38 }
 0x220   : > { %1366 = vst [vmem:[%s2467_s19 + $0x10] sm:$0xff] %v1216_v27 }
 0x224   : > { %v1553_v43 = vpop.f32.mrb[4].mxu0 }
 0x225   : > { %v1231_v39 = vadd.f32 %v1553_v43, %v2460_v12  ;;  %v1225_v55 = vpop.f32.mrb[5].mxu0 }
 0x226   : > { %v1226_v6 = vadd.f32 %v2460_v12, %v1225_v55  ;;  %v1577_v59 = vpop.f32.mrb[4].mxu1 }
 0x227   : > { %1369 = vst [vmem:[%s2467_s19 + $0x28] sm:$0xff] %v1231_v39  ;;  %v1311_v57 = vadd.f32 %v1577_v59, %v2460_v12  ;;  %v1305_v54 = vpop.f32.mrb[5].mxu1 }
 0x228   : > { %1368 = vst [vmem:[%s2467_s19 + $0x20] sm:$0xff] %v1226_v6  ;;  %v1306_v20 = vadd.f32 %v2460_v12, %v1305_v54 }
 0x229   : > { %1385 = vst [vmem:[%s2467_s19 + $0xa8] sm:$0xff] %v1311_v57 }
 0x22a   : > { %1384 = vst [vmem:[%s2467_s19 + $0xa0] sm:$0xff] %v1306_v20 }
 0x231   : > { %v1556_v30 = vpop.f32.mrb[6].mxu0 }
 0x232   : > { %v1241_v28 = vadd.f32 %v1556_v30, %v2460_v12  ;;  %v1235_v63 = vpop.f32.mrb[7].mxu0 }
 0x233   : > { %v1236_v49 = vadd.f32 %v2460_v12, %v1235_v63 }
 0x234   : > { %1371 = vst [vmem:[%s2467_s19 + $0x38] sm:$0xff] %v1241_v28 }
 0x235   : > { %1370 = vst [vmem:[%s2467_s19 + $0x30] sm:$0xff] %v1236_v49 }
 0x243   : > { %v1580_v13 = vpop.f32.mrb[6].mxu1 }
 0x244   : > { %v1321_v51 = vadd.f32 %v1580_v13, %v2460_v12  ;;  %v1315_v25 = vpop.f32.mrb[7].mxu1 }
 0x245   : > { %v1316_v29 = vadd.f32 %v2460_v12, %v1315_v25 }
 0x246   : > { %1387 = vst [vmem:[%s2467_s19 + $0xb8] sm:$0xff] %v1321_v51 }
 0x247   : > { %1386 = vst [vmem:[%s2467_s19 + $0xb0] sm:$0xff] %v1316_v29 }
 0x24e   : > { %v1559_v44 = vpop.f32.mrb[8].mxu0 }
 0x24f   : > { %v1251_v45 = vadd.f32 %v1559_v44, %v2460_v12  ;;  %v1245_v4 = vpop.f32.mrb[9].mxu0 }
 0x250   : > { %v1246_v47 = vadd.f32 %v2460_v12, %v1245_v4 }
 0x251   : > { %1373 = vst [vmem:[%s2467_s19 + $0x48] sm:$0xff] %v1251_v45 }
 0x252   : > { %1372 = vst [vmem:[%s2467_s19 + $0x40] sm:$0xff] %v1246_v47 }
 0x260   : > { %v1583_v22 = vpop.f32.mrb[8].mxu1 }
 0x261   : > { %v1331_v23 = vadd.f32 %v1583_v22, %v2460_v12  ;;  %v1325_v24 = vpop.f32.mrb[9].mxu1 }
 0x262   : > { %v1326_v34 = vadd.f32 %v2460_v12, %v1325_v24 }
 0x263   : > { %1389 = vst [vmem:[%s2467_s19 + $0xc8] sm:$0xff] %v1331_v23 }
 0x264   : > { %1388 = vst [vmem:[%s2467_s19 + $0xc0] sm:$0xff] %v1326_v34 }
 0x26b   : > { %v1562_v42 = vpop.f32.mrb[10].mxu0 }
 0x26c   : > { %v1261_v58 = vadd.f32 %v1562_v42, %v2460_v12  ;;  %v1255_v16 = vpop.f32.mrb[11].mxu0 }
 0x26d   : > { %v1256_v61 = vadd.f32 %v2460_v12, %v1255_v16 }
 0x26e   : > { %1375 = vst [vmem:[%s2467_s19 + $0x58] sm:$0xff] %v1261_v58 }
 0x26f   : > { %1374 = vst [vmem:[%s2467_s19 + $0x50] sm:$0xff] %v1256_v61 }
 0x27d   : > { %v1586_v36 = vpop.f32.mrb[10].mxu1 }
 0x27e   : > { %v1341_v11 = vadd.f32 %v1586_v36, %v2460_v12  ;;  %v1335_v31 = vpop.f32.mrb[11].mxu1 }
 0x27f   : > { %v1336_v14 = vadd.f32 %v2460_v12, %v1335_v31 }
 0x280   : > { %1391 = vst [vmem:[%s2467_s19 + $0xd8] sm:$0xff] %v1341_v11 }
 0x281   : > { %1390 = vst [vmem:[%s2467_s19 + $0xd0] sm:$0xff] %v1336_v14 }
 0x288   : > { %v1565_v52 = vpop.f32.mrb[12].mxu0 }
 0x289   : > { %v1271_v32 = vadd.f32 %v1565_v52, %v2460_v12  ;;  %v1265_v5 = vpop.f32.mrb[13].mxu0 }
 0x28a   : > { %v1266_v0 = vadd.f32 %v2460_v12, %v1265_v5 }
 0x28b   : > { %1377 = vst [vmem:[%s2467_s19 + $0x68] sm:$0xff] %v1271_v32 }
 0x28c   : > { %1376 = vst [vmem:[%s2467_s19 + $0x60] sm:$0xff] %v1266_v0 }
 0x29a   : > { %v1589_v1 = vpop.f32.mrb[12].mxu1 }
 0x29b   : > { %v1351_v2 = vadd.f32 %v1589_v1, %v2460_v12  ;;  %v1345_v40 = vpop.f32.mrb[13].mxu1 }
 0x29c   : > { %v1346_v33 = vadd.f32 %v2460_v12, %v1345_v40 }
 0x29d   : > { %1393 = vst [vmem:[%s2467_s19 + $0xe8] sm:$0xff] %v1351_v2 }
 0x29e   : > { %1392 = vst [vmem:[%s2467_s19 + $0xe0] sm:$0xff] %v1346_v33 }
 0x2ac   : > { %v1568_v7 = vpop.f32.mrb[14].mxu0 }
 0x2ad   : > { %v1281_v3 = vadd.f32 %v1568_v7, %v2460_v12  ;;  %v1275_v53 = vpop.f32.mrb[15].mxu0 }
 0x2ae   : > { %v1276_v26 = vadd.f32 %v2460_v12, %v1275_v53 }
 0x2af   : > { %1379 = vst [vmem:[%s2467_s19 + $0x78] sm:$0xff] %v1281_v3 }
 0x2b0   : > { %1378 = vst [vmem:[%s2467_s19 + $0x70] sm:$0xff] %v1276_v26  ;;  %v1592_v56 = vpop.f32.mrb[14].mxu1 }
 0x2b1   : > { %v1361_v35 = vadd.f32 %v1592_v56, %v2460_v12  ;;  %v1355_v37 = vpop.f32.mrb[15].mxu1 }
 0x2b2   : > { %v1356_v8 = vadd.f32 %v2460_v12, %v1355_v37 }
 0x2b3   : > { %1395 = vst [vmem:[%s2467_s19 + $0xf8] sm:$0xff] %v1361_v35 }
 0x2b4   : > { %1394 = vst [vmem:[%s2467_s19 + $0xf0] sm:$0xff] %v1356_v8 }
 0x2b5 PF: > { %s15_s18 = sadd.s32 1, %s1701_s18  }
 0x2b6   : > { %p12_p4 = scmp.ge.s32.totalorder %s15_s18, 6  }
 0x2b8   :  { %14 = sbr.rel (!%p12_p4) target bundleno = 1 (0x1), region = 70 }

</bundles_post_ra>
